<compile_context>
chip_gen: v7x
topology: tpu7x:2x2x1
jax: 0.10.0
libtpu: 0.0.40
codegen_flags: <defaults>
</compile_context>

<pallas_src>
import functools

import jax
import jax.numpy as jnp
from jax.experimental import pallas as pl
from jax.experimental.pallas import tpu as pltpu


def _cost_net_kernel(x_ref, w1_ref, b1_ref, w2_ref, b2_ref, o_ref):
    """out_row = W2 @ relu(W1 @ x_t + b1) + b2, lane-dense on the batch axis.

    Per-grid-step shapes:
      x_ref : (input_dims, block_b)  bf16/f32  (batch on lanes)
      w1_ref: (hidden, input_dims)   bf16/f32  (resident)
      b1_ref: (hidden, 1)            f32       (resident)
      w2_ref: (1, hidden)            f32       (resident)
      b2_ref: (1, 1)                 f32       (SMEM scalar)
      o_ref : (1, block_b)           f32       (lane-dense output row)
    """
    h = jnp.dot(w1_ref[...], x_ref[...],
                preferred_element_type=jnp.float32)        # (hidden, block_b), f32 acc
    h = jnp.maximum(h + b1_ref[...], 0.0)                  # bias + ReLU in f32 (VPU)
    o = jnp.dot(w2_ref[...], h,
                preferred_element_type=jnp.float32)        # (1, block_b)
    o_ref[...] = o + b2_ref[0, 0]                          # SMEM scalar bias add


@functools.partial(jax.jit, static_argnames=("block_b", "use_bf16"))
def cost_network_forward(x, w1, b1, w2, b2, *, block_b=512, use_bf16=True):
    """Forward pass of CostNetwork.

    x : (B, input_dims) f32
    w1: (hidden, input_dims), b1: (hidden,)   -- PyTorch nn.Linear layout
    w2: (1, hidden),          b2: (1,)
    returns: (B, 1) f32
    """
    B, d_in = x.shape
    hidden = w1.shape[0]
    if block_b % 128 != 0:
        raise ValueError("block_b must be a multiple of 128 (lane width)")

    num_tiles = pl.cdiv(B, block_b)
    b_pad = num_tiles * block_b

    compute_dtype = jnp.bfloat16 if use_bf16 else jnp.float32
    x_c = x.astype(compute_dtype)
    if b_pad != B:
        x_c = jnp.pad(x_c, ((0, b_pad - B), (0, 0)))
    x_t = x_c.T                                           # (d_in, b_pad): batch on lanes

    w1_c = w1.astype(compute_dtype)                       # (hidden, d_in)
    b1_c = b1.reshape(hidden, 1).astype(jnp.float32)      # (hidden, 1)
    w2_c = w2.reshape(1, hidden).astype(jnp.float32)      # (1, hidden)
    b2_c = b2.reshape(1, 1).astype(jnp.float32)           # (1, 1) -> SMEM

    out_row = pl.pallas_call(
        _cost_net_kernel,
        out_shape=jax.ShapeDtypeStruct((1, b_pad), jnp.float32),
        grid_spec=pltpu.PrefetchScalarGridSpec(
            num_scalar_prefetch=0,
            grid=(num_tiles,),
            in_specs=[
                pl.BlockSpec((d_in, block_b), lambda i: (0, i)),     # x tile
                pl.BlockSpec((hidden, d_in), lambda i: (0, 0)),      # W1 (resident)
                pl.BlockSpec((hidden, 1), lambda i: (0, 0)),         # b1 (resident)
                pl.BlockSpec((1, hidden), lambda i: (0, 0)),         # W2 (resident)
                pl.BlockSpec(memory_space=pltpu.MemorySpace.SMEM),   # b2 scalar
            ],
            out_specs=pl.BlockSpec((1, block_b), lambda i: (0, i)),  # lane-dense row
        ),
        compiler_params=pltpu.CompilerParams(
            dimension_semantics=("parallel",)),
    )(x_t, w1_c, b1_c, w2_c, b2_c)

    return out_row[0, :B].reshape(B, 1)


def init_params(key, input_dims, hidden_dims):
    """Deterministic init mimicking PyTorch nn.Linear (uniform +/- 1/sqrt(fan_in)).

    Weights are in the native PyTorch (out_features, in_features) layout.
    """
    k1, k2, k3, k4 = jax.random.split(key, 4)
    lim1 = 1.0 / jnp.sqrt(jnp.float32(input_dims))
    lim2 = 1.0 / jnp.sqrt(jnp.float32(hidden_dims))
    w1 = jax.random.uniform(k1, (hidden_dims, input_dims), jnp.float32, -lim1, lim1)
    b1 = jax.random.uniform(k2, (hidden_dims,), jnp.float32, -lim1, lim1)
    w2 = jax.random.uniform(k3, (1, hidden_dims), jnp.float32, -lim2, lim2)
    b2 = jax.random.uniform(k4, (1,), jnp.float32, -lim2, lim2)
    return w1, b1, w2, b2


if __name__ == "__main__":
    key = jax.random.PRNGKey(0)
    kx, kp = jax.random.split(key)

    batch = 1000          # deliberately NOT a multiple of the tile -> exercises padding
    input_dims = 16
    hidden_dims = 256     # module default

    x = jax.random.normal(kx, (batch, input_dims), jnp.float32)
    w1, b1, w2, b2 = init_params(kp, input_dims, hidden_dims)

    out = cost_network_forward(x, w1, b1, w2, b2, block_b=512, use_bf16=True)
    out = jax.block_until_ready(out)

    # Reference (same math as the PyTorch module) using the same bf16-rounded
    # x / W1 the kernel consumed, so the comparison stays tight.
    x_r = x.astype(jnp.bfloat16).astype(jnp.float32)
    w1_r = w1.astype(jnp.bfloat16).astype(jnp.float32)
    ref = jnp.maximum(x_r @ w1_r.T + b1[None, :], 0.0) @ w2.T + b2[None, :]

    assert out.shape == (batch, 1)
    assert jnp.allclose(out, ref, atol=2e-3, rtol=2e-3), \
        float(jnp.max(jnp.abs(out - ref)))

    print("KERNEL_OK")
</pallas_src>

<mosaic_0001>
module attributes {stable_mosaic.version = 11 : i64} {
  func.func @_cost_net_kernel(%arg0: i32, %arg1: memref<16x512xbf16, #tpu.memory_space<vmem>>, %arg2: memref<256x16xbf16, #tpu.memory_space<vmem>>, %arg3: memref<256x1xf32, #tpu.memory_space<vmem>>, %arg4: memref<1x256xf32, #tpu.memory_space<vmem>>, %arg5: memref<1x1xf32, #tpu.memory_space<smem>>, %arg6: memref<1x512xf32, #tpu.memory_space<vmem>>) attributes {dimension_semantics = [#tpu.dimension_semantics<parallel>], iteration_bounds = array<i64: 2>, scalar_prefetch = 0 : i64, scratch_operands = 0 : i64, tpu.core_type = #tpu.core_type<tc>, window_params = [{transform_indices = @transform_0, window_bounds = array<i64: 16, 512>}, {pipeline_mode = #tpu.pipeline_mode<synchronous>, transform_indices = @transform_1, window_bounds = array<i64: 256, 16>}, {pipeline_mode = #tpu.pipeline_mode<synchronous>, transform_indices = @transform_2, window_bounds = array<i64: 256, 1>}, {pipeline_mode = #tpu.pipeline_mode<synchronous>, transform_indices = @transform_3, window_bounds = array<i64: 1, 256>}, {transform_indices = @transform_4, window_bounds = array<i64: 1, 1>}, {transform_indices = @transform_5, window_bounds = array<i64: 1, 512>}]} {
    %c0 = arith.constant 0 : index
    %c0_0 = arith.constant 0 : index
    %0 = vector.load %arg2[%c0, %c0_0] : memref<256x16xbf16, #tpu.memory_space<vmem>>, vector<256x16xbf16>
    %c0_1 = arith.constant 0 : index
    %c0_2 = arith.constant 0 : index
    %1 = vector.load %arg1[%c0_1, %c0_2] : memref<16x512xbf16, #tpu.memory_space<vmem>>, vector<16x512xbf16>
    %cst = arith.constant dense<0.000000e+00> : vector<256x512xf32>
    %2 = tpu.matmul %0, %1, %cst {dimension_numbers = #tpu.dot_dimension_numbers<[1], [0], [0], [1], [0, 0, 1, 1], [], []>} : vector<256x16xbf16>, vector<16x512xbf16>, vector<256x512xf32> -> vector<256x512xf32>
    %c0_3 = arith.constant 0 : index
    %c0_4 = arith.constant 0 : index
    %3 = vector.load %arg3[%c0_3, %c0_4] : memref<256x1xf32, #tpu.memory_space<vmem>>, vector<256x1xf32>
    %4 = vector.broadcast %3 : vector<256x1xf32> to vector<256x512xf32>
    %5 = arith.addf %2, %4 : vector<256x512xf32>
    %cst_5 = arith.constant 0.000000e+00 : f32
    %6 = vector.broadcast %cst_5 : f32 to vector<256x512xf32>
    %7 = arith.maximumf %5, %6 : vector<256x512xf32>
    %c0_6 = arith.constant 0 : index
    %c0_7 = arith.constant 0 : index
    %8 = vector.load %arg4[%c0_6, %c0_7] : memref<1x256xf32, #tpu.memory_space<vmem>>, vector<1x256xf32>
    %cst_8 = arith.constant dense<0.000000e+00> : vector<1x512xf32>
    %9 = tpu.matmul %8, %7, %cst_8 {dimension_numbers = #tpu.dot_dimension_numbers<[1], [0], [0], [1], [0, 0, 1, 1], [], []>} : vector<1x256xf32>, vector<256x512xf32>, vector<1x512xf32> -> vector<1x512xf32>
    %c0_9 = arith.constant 0 : index
    %c0_10 = arith.constant 0 : index
    %10 = memref.load %arg5[%c0_9, %c0_10] : memref<1x1xf32, #tpu.memory_space<smem>>
    %11 = vector.broadcast %10 : f32 to vector<1x512xf32>
    %12 = arith.addf %9, %11 : vector<1x512xf32>
    %c0_11 = arith.constant 0 : index
    %c0_12 = arith.constant 0 : index
    %13 = vector.load %arg6[%c0_11, %c0_12] : memref<1x512xf32, #tpu.memory_space<vmem>>, vector<1x512xf32>
    tpu.vector_store %arg6[%c0_11, %c0_12], %12 {strides = array<i32>} : memref<1x512xf32, #tpu.memory_space<vmem>>, vector<1x512xf32>,
    return
  }
  func.func @transform_0(%arg0: i32) -> (i32, i32) {
    %c0_i32 = arith.constant 0 : i32
    %c0_i32_0 = arith.constant 0 : i32
    return %c0_i32, %arg0 : i32, i32
  }
  func.func @transform_1(%arg0: i32) -> (i32, i32) {
    %c0_i32 = arith.constant 0 : i32
    %c0_i32_0 = arith.constant 0 : i32
    %c0_i32_1 = arith.constant 0 : i32
    return %c0_i32, %c0_i32_0 : i32, i32
  }
  func.func @transform_2(%arg0: i32) -> (i32, i32) {
    %c0_i32 = arith.constant 0 : i32
    %c0_i32_0 = arith.constant 0 : i32
    %c0_i32_1 = arith.constant 0 : i32
    return %c0_i32, %c0_i32_0 : i32, i32
  }
  func.func @transform_3(%arg0: i32) -> (i32, i32) {
    %c0_i32 = arith.constant 0 : i32
    %c0_i32_0 = arith.constant 0 : i32
    %c0_i32_1 = arith.constant 0 : i32
    return %c0_i32, %c0_i32_0 : i32, i32
  }
  func.func @transform_4(%arg0: i32) -> (i32, i32) {
    %c0_i32 = arith.constant 0 : i32
    %c0_i32_0 = arith.constant 0 : i32
    %c0_i32_1 = arith.constant 0 : i32
    return %c0_i32, %c0_i32_0 : i32, i32
  }
  func.func @transform_5(%arg0: i32) -> (i32, i32) {
    %c0_i32 = arith.constant 0 : i32
    %c0_i32_0 = arith.constant 0 : i32
    return %c0_i32, %arg0 : i32, i32
  }
}

</mosaic_0001>

<bundles_post_ra>
// kernel: cost_network_forward.1
= control target key start
LH: loop header
LB: loop body
LE: loop exit
PB: predicated region body
PF: predicated region fallthrough
CT: control target
= control target key end

     0   :  { %s1968_s0 = inlined_call_operand.vmem [shape: bf16[16,1024], index: 0, kind: input, shape index: {}]   ;;  %s1969_s1 = inlined_call_operand.vmem [shape: bf16[256,16], index: 1, kind: input, shape index: {}]   ;;  %s1970_s2 = inlined_call_operand.vmem [shape: f32[256,1], index: 2, kind: input, shape index: {}]   ;;  %s1971_s3 = inlined_call_operand.vmem [shape: f32[1,256], index: 3, kind: input, shape index: {}]   ;;  %s1972_s4 = inlined_call_operand.<no memory space> [shape: f32[1,1], index: 4, kind: input, shape index: {}]   ;;  %s1973_s5 = inlined_call_operand.vmem [shape: f32[1,1024], index: 5, kind: output, shape index: {}]  }
   0x1   :  { %10 = sst [smem:[#allocation2]] %s1972_s4 }
   0x2   :  { %s1693_s20 = smov 0   ;;  %s1695_s21 = smov 0  }
   0x3   :  { %s1697_s22 = smov 0  }
   0x4 LB: > { %s1390_s4 = sadd.s32 4294967295, %s1656_s22   ;;  %s1710_s23 = sadd.s32 1, %s1656_s22   ;;  %s1656_s22 = sphi %s1697_s22, %s1976_s22   ;;  %s1652_s21 = sphi %s1695_s21, %s1975_s21   ;;  %s1648_s20 = sphi %s1693_s20, %s1974_s20  }
   0x5   : > { %s20_s24 = ssub.s32 %s1656_s22, %s1710_s23  ;;  %s23_s25 = sadd.s32 1, %s1652_s21 }
   0x6   : > { %p21_p0 = scmp.eq.s32.totalorder %s20_s24, 0  ;;  %p30_p1 = scmp.ne.s32.totalorder %s1652_s21, %s1648_s20 }
   0x7   : > { %p31_p2 = scmp.eq.s32.totalorder %s1656_s22, 0  ;;  %p1393_p4 = scmp.ge.s32.totalorder %s1656_s22, 2 }
   0x8   : > { %s1719_s26 = scalar_select %p21_p0, %s1652_s21, %s23_s25  }
   0x9   : > { %p32_p3 = por %p31_p2, %p30_p1  ;;  %178 = sbr.rel (%p1393_p4) target bundleno = 23 (0x17), region = 32 }
  0x10   : > { %181 = sbr.rel (!%p32_p3) target bundleno = 23 (0x17), region = 36  ;;  %s183_s27 = sand.u32 (%p32_p3), 1, %s1652_s21  }
  0x11   : > { %s1454_s28 = sshll.u32 (%p32_p3), %s1656_s22, 4  ;;  %s1394_s29 = sshll.u32 (%p32_p3), %s183_s27, 5 }
  0x12   : > { %s188_s7 = scalar_lea.vmem (%p32_p3), %s1968_s0, %s1454_s28  ;;  %s185_s8 = scalar_lea.vmem (%p32_p3), [#allocation3], %s1394_s29 }
  0x13   : > { %v201_v0 = vld [vmem:[%s188_s7] sm:$0xff] (%p32_p3)  ;;  %v203_v1 = vld [vmem:[%s188_s7 + $0x8] sm:$0xff] (%p32_p3) }
  0x14   : > { %v205_v2 = vld [vmem:[%s188_s7 + $0x20] sm:$0xff] (%p32_p3)  ;;  %202 = vst [vmem:[%s185_s8] sm:$0xff] (%p32_p3), %v201_v0  ;;  %204 = vst [vmem:[%s185_s8 + $0x8] sm:$0xff] (%p32_p3), %v203_v1  ;;  %v207_v3 = vld [vmem:[%s188_s7 + $0x28] sm:$0xff] (%p32_p3) }
  0x15   : > { %206 = vst [vmem:[%s185_s8 + $0x10] sm:$0xff] (%p32_p3), %v205_v2  ;;  %208 = vst [vmem:[%s185_s8 + $0x18] sm:$0xff] (%p32_p3), %v207_v3 }
  0x17 PF: > { %p1397_p5 = scmp.ge.s32.totalorder %s1656_s22, 1  ;;  %p213_p6 = scmp.lt.s32.totalorder %s1656_s22, 3 }
  0x19   : > { %p214_p7 = pnand %p1397_p5, %p213_p6 }
  0x1a   : > { %s220_s9 = sand.u32 (!%p214_p7), 1, %s1648_s20   ;;  %v1658_v4 = vmov (!%p214_p7), 0   ;;  %v1617_v7 = vld [vmem:[%s1969_s1] sm:$0xff] (!%p214_p7)   ;;  %vm581_vm0 = vcmask (!%p214_p7), 130048   ;;  %v291_v11 = vld [vmem:[%s1970_s2 + $0x10] sm:$0xff] (!%p214_p7)  ;;  %v290_v12 = vld [vmem:[%s1970_s2 + $0x8] sm:$0xff] (!%p214_p7)  ;;  %v1148_v58 = vlaneseq (!%p214_p7) }
  0x1b   : > { %217 = sbr.rel (%p214_p7) target bundleno = 603 (0x25b), region = 59  ;;  %s1398_s10 = sshll.u32 (!%p214_p7), %s220_s9, 5  ;;  %662 = vmatprep.mubr.bf16.mxu0 (!%p214_p7), %v1658_v4  ;;  %855 = vmatprep.mubr.bf16.mxu1 (!%p214_p7), %v1658_v4  ;;  %v289_v10 = vld [vmem:[%s1970_s2] sm:$0xff] (!%p214_p7)  ;;  %v292_v13 = vld [vmem:[%s1970_s2 + $0x18] sm:$0xff] (!%p214_p7)  ;;  %v294_v15 = vld [vmem:[%s1970_s2 + $0x28] sm:$0xff] (!%p214_p7) }
  0x1c   : > { %1609 = vset.pattern.permute.xlu0 (!%p214_p7), %v1658_v4  ;;  %1610 = vset.pattern.permute.xlu1 (!%p214_p7), %v1658_v4  ;;  %s222_s11 = scalar_lea.vmem (!%p214_p7), [#allocation3], %s1398_s10  ;;  %v293_v14 = vld [vmem:[%s1970_s2 + $0x20] sm:$0xff] (!%p214_p7)  ;;  %v1618_v16 = vld [vmem:[%s1969_s1 + $0x8] sm:$0xff] (!%p214_p7)   ;;  %v295_v17 = vld [vmem:[%s1970_s2 + $0x30] sm:$0xff] (!%p214_p7)  ;;  %v1941_v61 = vshrl.u32 (!%p214_p7), %v1148_v58, 7  ;;  %s1145_s7 = sld [smem:[#allocation2]] (!%p214_p7) }
  0x1d   : > { %v1611_v5 = vld [vmem:[%s222_s11 + $0x4] ss:$16 sps:$4 sm:$0xff] (!%p214_p7)   ;;  %v1613_v6 = vld [vmem:[%s222_s11 + $0xc] ss:$16 sps:$4 sm:$0xff] (!%p214_p7)   ;;  %v1615_v8 = vld [vmem:[%s222_s11] ss:$16 sps:$4 sm:$0xff] (!%p214_p7)   ;;  %323 = vperm.xlu0 (!%p214_p7), %1609, %v289_v10   ;;  %333 = vperm.xlu1 (!%p214_p7), %1610, %v291_v11  }
  0x1e   : > { %630 = vmatprep.subr.bf16.mxu0 (!%p214_p7), %v1611_v5  ;;  %v1616_v9 = vld [vmem:[%s222_s11 + $0x8] ss:$16 sps:$4 sm:$0xff] (!%p214_p7)   ;;  %823 = vmatprep.subr.bf16.mxu1 (!%p214_p7), %v1613_v6  ;;  %v297_v19 = vld [vmem:[%s1970_s2 + $0x40] sm:$0xff] (!%p214_p7)  ;;  %v1619_v21 = vld [vmem:[%s1969_s1 + $0x10] sm:$0xff] (!%p214_p7)   ;;  %s1399_s8 = sshll.u32 (!%p214_p7), %s1390_s4, 2  ;;  %vm1331_vm1 = vcmp.lt.s32.totalorder (!%p214_p7), %v1148_v58, 512 }
  0x1f   : > { %631 = vmatpush1.bf16.msra.mxu0 (!%p214_p7), %v1615_v8  ;;  %824 = vmatpush1.bf16.msra.mxu1 (!%p214_p7), %v1616_v9  ;;  %v296_v18 = vld [vmem:[%s1970_s2 + $0x38] sm:$0xff] (!%p214_p7)  ;;  %v298_v20 = vld [vmem:[%s1970_s2 + $0x48] sm:$0xff] (!%p214_p7)  ;;  %v299_v22 = vld [vmem:[%s1970_s2 + $0x50] sm:$0xff] (!%p214_p7)  ;;  %p248_p8 = scmp.lt.s32.totalorder (!%p214_p7), %s1399_s8, 7 }
  0x20   : > { %v300_v23 = vld [vmem:[%s1970_s2 + $0x58] sm:$0xff] (!%p214_p7)  ;;  %v301_v24 = vld [vmem:[%s1970_s2 + $0x60] sm:$0xff] (!%p214_p7)  ;;  %v302_v25 = vld [vmem:[%s1970_s2 + $0x68] sm:$0xff] (!%p214_p7) }
  0x21   : > { %328 = vperm.xlu0 (!%p214_p7), %1609, %v290_v12   ;;  %338 = vperm.xlu1 (!%p214_p7), %1610, %v292_v13   ;;  %v1620_v26 = vld [vmem:[%s1969_s1 + $0x18] sm:$0xff] (!%p214_p7)   ;;  %v303_v27 = vld [vmem:[%s1970_s2 + $0x70] sm:$0xff] (!%p214_p7)  ;;  %v305_v29 = vld [vmem:[%s1970_s2 + $0x80] sm:$0xff] (!%p214_p7) }
  0x22   : > { %1420 = vmatmul.mubr.msk.bf16.vlgmr.msra.gmra.mrb[0].mxu0 %vm581_vm0, %v1617_v7  ;;  %1436 = vmatmul.mubr.msk.bf16.vlgmr.msra.gmra.mrb[0].mxu1 %vm581_vm0, %v1617_v7  ;;  %v304_v28 = vld [vmem:[%s1970_s2 + $0x78] sm:$0xff]  ;;  %v306_v30 = vld [vmem:[%s1970_s2 + $0x88] sm:$0xff]  ;;  %v1621_v31 = vld [vmem:[%s1969_s1 + $0x20] sm:$0xff]   ;;  %s1978_s8 = smov (!%p248_p8, %s1399_s8), 7 }
  0x23   : > { %672 = vmatprep.mubr.bf16.mxu0 %v1658_v4  ;;  %865 = vmatprep.mubr.bf16.mxu1 %v1658_v4  ;;  %v307_v32 = vld [vmem:[%s1970_s2 + $0x90] sm:$0xff]  ;;  %v308_v33 = vld [vmem:[%s1970_s2 + $0x98] sm:$0xff]  ;;  %v309_v34 = vld [vmem:[%s1970_s2 + $0xa0] sm:$0xff]  ;;  %s250_s9 = scalar_lea.vmem %s1973_s5, %s1978_s8 }
  0x24   : > { %v310_v35 = vld [vmem:[%s1970_s2 + $0xa8] sm:$0xff]  ;;  %v311_v37 = vld [vmem:[%s1970_s2 + $0xb0] sm:$0xff]  ;;  %v312_v38 = vld [vmem:[%s1970_s2 + $0xb8] sm:$0xff] }
  0x25   : > { %343 = vperm.xlu0 %1609, %v293_v14   ;;  %348 = vperm.xlu1 %1610, %v294_v15   ;;  %v1622_v36 = vld [vmem:[%s1969_s1 + $0x28] sm:$0xff]   ;;  %v313_v39 = vld [vmem:[%s1970_s2 + $0xc0] sm:$0xff]  ;;  %v1623_v41 = vld [vmem:[%s1969_s1 + $0x30] sm:$0xff]  }
  0x26   : > { %v314_v40 = vld [vmem:[%s1970_s2 + $0xc8] sm:$0xff]  ;;  %v315_v42 = vld [vmem:[%s1970_s2 + $0xd0] sm:$0xff]  ;;  %v316_v43 = vld [vmem:[%s1970_s2 + $0xd8] sm:$0xff] }
  0x27   : > { %v317_v44 = vld [vmem:[%s1970_s2 + $0xe0] sm:$0xff]  ;;  %v318_v45 = vld [vmem:[%s1970_s2 + $0xe8] sm:$0xff]  ;;  %v1624_v46 = vld [vmem:[%s1969_s1 + $0x38] sm:$0xff]  }
  0x28   : > { %v319_v47 = vld [vmem:[%s1970_s2 + $0xf0] sm:$0xff]  ;;  %v320_v48 = vld [vmem:[%s1970_s2 + $0xf8] sm:$0xff]  ;;  %v1625_v49 = vld [vmem:[%s1969_s1 + $0x40] sm:$0xff]  }
  0x29   : > { %353 = vperm.xlu0 %1609, %v295_v17   ;;  %358 = vperm.xlu1 %1610, %v296_v18   ;;  %v1626_v50 = vld [vmem:[%s1969_s1 + $0x48] sm:$0xff]   ;;  %v1627_v51 = vld [vmem:[%s1969_s1 + $0x50] sm:$0xff]   ;;  %v1628_v52 = vld [vmem:[%s1969_s1 + $0x58] sm:$0xff]  }
  0x2a   : > { %1421 = vmatmul.mubr.msk.bf16.gmra.mrb[4].mxu0 %vm581_vm0, %v1618_v16  ;;  %1437 = vmatmul.mubr.msk.bf16.gmra.mrb[4].mxu1 %vm581_vm0, %v1618_v16  ;;  %v1629_v53 = vld [vmem:[%s1969_s1 + $0x60] sm:$0xff]   ;;  %v1630_v54 = vld [vmem:[%s1969_s1 + $0x68] sm:$0xff]   ;;  %v1631_v55 = vld [vmem:[%s1969_s1 + $0x70] sm:$0xff]  }
  0x2b   : > { %682 = vmatprep.mubr.bf16.mxu0 %v1658_v4  ;;  %875 = vmatprep.mubr.bf16.mxu1 %v1658_v4  ;;  %v1632_v56 = vld [vmem:[%s1969_s1 + $0x78] sm:$0xff]   ;;  %v1144_v9 = vld [vmem:[%s1971_s3] sm:$0x3] }
  0x2d   : > { %363 = vperm.xlu0 %1609, %v297_v19   ;;  %368 = vperm.xlu1 %1610, %v298_v20  }
  0x31   : > { %373 = vperm.xlu0 %1609, %v299_v22   ;;  %378 = vperm.xlu1 %1610, %v300_v23  }
  0x32   : > { %1422 = vmatmul.mubr.msk.bf16.gmra.mrb[8].mxu0 %vm581_vm0, %v1619_v21  ;;  %1438 = vmatmul.mubr.msk.bf16.gmra.mrb[8].mxu1 %vm581_vm0, %v1619_v21 }
  0x33   : > { %692 = vmatprep.mubr.bf16.mxu0 %v1658_v4  ;;  %885 = vmatprep.mubr.bf16.mxu1 %v1658_v4 }
  0x35   : > { %383 = vperm.xlu0 %1609, %v301_v24   ;;  %388 = vperm.xlu1 %1610, %v302_v25  }
  0x39   : > { %393 = vperm.xlu0 %1609, %v303_v27   ;;  %398 = vperm.xlu1 %1610, %v304_v28  }
  0x3a   : > { %1423 = vmatmul.mubr.msk.bf16.gmra.mrb[12].mxu0 %vm581_vm0, %v1620_v26  ;;  %1439 = vmatmul.mubr.msk.bf16.gmra.mrb[12].mxu1 %vm581_vm0, %v1620_v26 }
  0x3b   : > { %702 = vmatprep.mubr.bf16.mxu0 %v1658_v4  ;;  %895 = vmatprep.mubr.bf16.mxu1 %v1658_v4 }
  0x3d   : > { %403 = vperm.xlu0 %1609, %v305_v29   ;;  %408 = vperm.xlu1 %1610, %v306_v30  }
  0x41   : > { %413 = vperm.xlu0 %1609, %v307_v32   ;;  %418 = vperm.xlu1 %1610, %v308_v33  }
  0x42   : > { %1424 = vmatmul.mubr.msk.bf16.gmra.mrb[16].mxu0 %vm581_vm0, %v1621_v31  ;;  %1440 = vmatmul.mubr.msk.bf16.gmra.mrb[16].mxu1 %vm581_vm0, %v1621_v31 }
  0x43   : > { %712 = vmatprep.mubr.bf16.mxu0 %v1658_v4  ;;  %905 = vmatprep.mubr.bf16.mxu1 %v1658_v4 }
  0x45   : > { %423 = vperm.xlu0 %1609, %v309_v34   ;;  %428 = vperm.xlu1 %1610, %v310_v35  }
  0x49   : > { %433 = vperm.xlu0 %1609, %v311_v37   ;;  %438 = vperm.xlu1 %1610, %v312_v38  }
  0x4a   : > { %1425 = vmatmul.mubr.msk.bf16.gmra.mrb[20].mxu0 %vm581_vm0, %v1622_v36  ;;  %1441 = vmatmul.mubr.msk.bf16.gmra.mrb[20].mxu1 %vm581_vm0, %v1622_v36 }
  0x4b   : > { %722 = vmatprep.mubr.bf16.mxu0 %v1658_v4  ;;  %915 = vmatprep.mubr.bf16.mxu1 %v1658_v4 }
  0x4d   : > { %443 = vperm.xlu0 %1609, %v313_v39   ;;  %448 = vperm.xlu1 %1610, %v314_v40  }
  0x51   : > { %453 = vperm.xlu0 %1609, %v315_v42   ;;  %458 = vperm.xlu1 %1610, %v316_v43  }
  0x52   : > { %1426 = vmatmul.mubr.msk.bf16.gmra.mrb[24].mxu0 %vm581_vm0, %v1623_v41  ;;  %1442 = vmatmul.mubr.msk.bf16.gmra.mrb[24].mxu1 %vm581_vm0, %v1623_v41 }
  0x53   : > { %732 = vmatprep.mubr.bf16.mxu0 %v1658_v4  ;;  %925 = vmatprep.mubr.bf16.mxu1 %v1658_v4 }
  0x55   : > { %463 = vperm.xlu0 %1609, %v317_v44   ;;  %468 = vperm.xlu1 %1610, %v318_v45  }
  0x59   : > { %473 = vperm.xlu0 %1609, %v319_v47   ;;  %478 = vperm.xlu1 %1610, %v320_v48  }
  0x5a   : > { %1427 = vmatmul.mubr.msk.bf16.gmra.mrb[28].mxu0 %vm581_vm0, %v1624_v46  ;;  %1443 = vmatmul.mubr.msk.bf16.gmra.mrb[28].mxu1 %vm581_vm0, %v1624_v46 }
  0x5b   : > { %742 = vmatprep.mubr.bf16.mxu0 %v1658_v4  ;;  %935 = vmatprep.mubr.bf16.mxu1 %v1658_v4 }
  0x62   : > { %1428 = vmatmul.mubr.msk.bf16.gmra.mrb[32].mxu0 %vm581_vm0, %v1625_v49  ;;  %1444 = vmatmul.mubr.msk.bf16.gmra.mrb[32].mxu1 %vm581_vm0, %v1625_v49 }
  0x63   : > { %752 = vmatprep.mubr.bf16.mxu0 %v1658_v4  ;;  %945 = vmatprep.mubr.bf16.mxu1 %v1658_v4 }
  0x6a   : > { %1429 = vmatmul.mubr.msk.bf16.gmra.mrb[36].mxu0 %vm581_vm0, %v1626_v50  ;;  %1445 = vmatmul.mubr.msk.bf16.gmra.mrb[36].mxu1 %vm581_vm0, %v1626_v50 }
  0x6b   : > { %762 = vmatprep.mubr.bf16.mxu0 %v1658_v4  ;;  %955 = vmatprep.mubr.bf16.mxu1 %v1658_v4 }
  0x72   : > { %1430 = vmatmul.mubr.msk.bf16.gmra.mrb[40].mxu0 %vm581_vm0, %v1627_v51  ;;  %1446 = vmatmul.mubr.msk.bf16.gmra.mrb[40].mxu1 %vm581_vm0, %v1627_v51 }
  0x73   : > { %772 = vmatprep.mubr.bf16.mxu0 %v1658_v4  ;;  %965 = vmatprep.mubr.bf16.mxu1 %v1658_v4 }
  0x7a   : > { %1431 = vmatmul.mubr.msk.bf16.gmra.mrb[44].mxu0 %vm581_vm0, %v1628_v52  ;;  %1447 = vmatmul.mubr.msk.bf16.gmra.mrb[44].mxu1 %vm581_vm0, %v1628_v52 }
  0x7b   : > { %782 = vmatprep.mubr.bf16.mxu0 %v1658_v4  ;;  %975 = vmatprep.mubr.bf16.mxu1 %v1658_v4 }
  0x82   : > { %1432 = vmatmul.mubr.msk.bf16.gmra.mrb[48].mxu0 %vm581_vm0, %v1629_v53  ;;  %1448 = vmatmul.mubr.msk.bf16.gmra.mrb[48].mxu1 %vm581_vm0, %v1629_v53 }
  0x83   : > { %792 = vmatprep.mubr.bf16.mxu0 %v1658_v4  ;;  %985 = vmatprep.mubr.bf16.mxu1 %v1658_v4 }
  0x8a   : > { %1433 = vmatmul.mubr.msk.bf16.gmra.mrb[52].mxu0 %vm581_vm0, %v1630_v54  ;;  %1449 = vmatmul.mubr.msk.bf16.gmra.mrb[52].mxu1 %vm581_vm0, %v1630_v54 }
  0x8b   : > { %802 = vmatprep.mubr.bf16.mxu0 %v1658_v4  ;;  %995 = vmatprep.mubr.bf16.mxu1 %v1658_v4 }
  0x92   : > { %1434 = vmatmul.mubr.msk.bf16.gmra.mrb[56].mxu0 %vm581_vm0, %v1631_v55  ;;  %1450 = vmatmul.mubr.msk.bf16.gmra.mrb[56].mxu1 %vm581_vm0, %v1631_v55 }
  0x93   : > { %812 = vmatprep.mubr.bf16.mxu0 %v1658_v4  ;;  %1005 = vmatprep.mubr.bf16.mxu1 %v1658_v4  ;;  %v1154_v4 = vsub.s32 1, %v1941_v61 }
  0x95   : > { %v1155_v20 = vrot.slane %v1144_v9, %v1154_v4 }
  0x9a   : > { %1435 = vmatmul.mubr.msk.bf16.gmra.mrb[60].mxu0 %vm581_vm0, %v1632_v56  ;;  %1451 = vmatmul.mubr.msk.bf16.gmra.mrb[60].mxu1 %vm581_vm0, %v1632_v56 }
  0x9b   : > { %1222 = vmatprep.mubr.f32.mxu0 %v1155_v20  ;;  %1293 = vmatprep.mubr.f32.mxu1 %v1155_v20 }
  0x9c   : > { %v324_v57 = vpop.permute.xlu0 %323  ;;  %v334_v60 = vpop.permute.xlu1 %333 }
  0xa0   : > { %v329_v59 = vpop.permute.xlu0 %328  ;;  %v339_v25 = vpop.permute.xlu1 %338 }
  0xa4   : > { %v344_v54 = vpop.permute.xlu0 %343  ;;  %v349_v55 = vpop.permute.xlu1 %348 }
  0xf5   : > { %v664_v62 = vpop.f32.mrb[0].mxu0  ;;  %v857_v63 = vpop.f32.mrb[0].mxu1 }
  0xf6   : > { %v665_v0 = vadd.f32 %v664_v62, %v324_v57  ;;  %v858_v1 = vadd.f32 %v857_v63, %v324_v57  ;;  %v666_v2 = vpop.f32.mrb[1].mxu0  ;;  %v859_v3 = vpop.f32.mrb[1].mxu1 }
  0xf7   : > { %v667_v5 = vadd.f32 %v666_v2, %v324_v57  ;;  %v860_v6 = vadd.f32 %v859_v3, %v324_v57  ;;  %v668_v7 = vpop.f32.mrb[2].mxu0  ;;  %v861_v8 = vpop.f32.mrb[2].mxu1 }
  0xf8   : > { %v669_v10 = vadd.f32 %v668_v7, %v329_v59  ;;  %v862_v11 = vadd.f32 %v861_v8, %v329_v59  ;;  %v670_v12 = vpop.f32.mrb[3].mxu0  ;;  %v863_v13 = vpop.f32.mrb[3].mxu1  ;;  %v1016_v14 = vmax.f32 %v665_v0, 0.0  ;;  %v1018_v17 = vmax.f32 %v858_v1, 0.0 }
  0xf9   : > { %v671_v15 = vadd.f32 %v670_v12, %v329_v59  ;;  %v864_v16 = vadd.f32 %v863_v13, %v329_v59  ;;  %v1017_v21 = vmax.f32 %v667_v5, 0.0  ;;  %v1019_v22 = vmax.f32 %v860_v6, 0.0 }
  0xfa   : > { %v1020_v18 = vmax.f32 %v669_v10, 0.0  ;;  %v1022_v19 = vmax.f32 %v862_v11, 0.0 }
  0xfb   : > { %v1021_v23 = vmax.f32 %v671_v15, 0.0  ;;  %v1023_v24 = vmax.f32 %v864_v16, 0.0 }
  0xfc   : > { %v1457_v26 = vpack.c.bf16 %v1020_v18, %v1016_v14  ;;  %v1521_v27 = vpack.c.bf16 %v1022_v19, %v1018_v17 }
  0xfd   : > { %v1455_v28 = vpack.c.bf16 %v1021_v23, %v1017_v21  ;;  %v1519_v29 = vpack.c.bf16 %v1023_v24, %v1019_v22  ;;  %v674_v30 = vpop.f32.mrb[4].mxu0  ;;  %v867_v31 = vpop.f32.mrb[4].mxu1 }
  0xfe   : > { %v675_v32 = vadd.f32 %v674_v30, %v334_v60  ;;  %v868_v33 = vadd.f32 %v867_v31, %v334_v60  ;;  %v676_v34 = vpop.f32.mrb[5].mxu0  ;;  %v869_v35 = vpop.f32.mrb[5].mxu1 }
  0xff   : > { %v677_v36 = vadd.f32 %v676_v34, %v334_v60  ;;  %v870_v37 = vadd.f32 %v869_v35, %v334_v60  ;;  %v678_v38 = vpop.f32.mrb[6].mxu0  ;;  %v871_v39 = vpop.f32.mrb[6].mxu1  ;;  %1456 = vmatprep.subr.bf16.mxu0 %v1455_v28  ;;  %1520 = vmatprep.subr.bf16.mxu1 %v1519_v29 }
 0x100   : > { %v679_v40 = vadd.f32 %v678_v38, %v339_v25  ;;  %v872_v41 = vadd.f32 %v871_v39, %v339_v25  ;;  %v680_v42 = vpop.f32.mrb[7].mxu0  ;;  %v873_v43 = vpop.f32.mrb[7].mxu1  ;;  %1458 = vmatpush1.bf16.msra.mxu0 %v1457_v26  ;;  %1522 = vmatpush1.bf16.msra.mxu1 %v1521_v27  ;;  %v1024_v46 = vmax.f32 %v675_v32, 0.0  ;;  %v1026_v47 = vmax.f32 %v868_v33, 0.0 }
 0x101   : > { %v681_v44 = vadd.f32 %v680_v42, %v339_v25  ;;  %v874_v45 = vadd.f32 %v873_v43, %v339_v25  ;;  %v1025_v50 = vmax.f32 %v677_v36, 0.0  ;;  %v1027_v51 = vmax.f32 %v870_v37, 0.0  ;;  %v354_v22 = vpop.permute.xlu0 %353  ;;  %v359_v23 = vpop.permute.xlu1 %358 }
 0x102   : > { %v1028_v48 = vmax.f32 %v679_v40, 0.0  ;;  %v1030_v49 = vmax.f32 %v872_v41, 0.0 }
 0x103   : > { %v1029_v52 = vmax.f32 %v681_v44, 0.0  ;;  %v1031_v53 = vmax.f32 %v874_v45, 0.0 }
 0x104   : > { %v1461_v56 = vpack.c.bf16 %v1028_v48, %v1024_v46  ;;  %v1525_v57 = vpack.c.bf16 %v1030_v49, %v1026_v47 }
 0x105   : > { %v1459_v59 = vpack.c.bf16 %v1029_v52, %v1025_v50  ;;  %v1523_v60 = vpack.c.bf16 %v1031_v53, %v1027_v51  ;;  %v684_v62 = vpop.f32.mrb[8].mxu0  ;;  %v877_v63 = vpop.f32.mrb[8].mxu1 }
 0x106   : > { %v685_v0 = vadd.f32 %v684_v62, %v344_v54  ;;  %v878_v1 = vadd.f32 %v877_v63, %v344_v54  ;;  %v686_v2 = vpop.f32.mrb[9].mxu0  ;;  %v879_v3 = vpop.f32.mrb[9].mxu1 }
 0x107   : > { %v687_v4 = vadd.f32 %v686_v2, %v344_v54  ;;  %v880_v5 = vadd.f32 %v879_v3, %v344_v54  ;;  %v688_v6 = vpop.f32.mrb[10].mxu0  ;;  %v881_v7 = vpop.f32.mrb[10].mxu1  ;;  %1460 = vmatprep.subr.bf16.mxu0 %v1459_v59  ;;  %1524 = vmatprep.subr.bf16.mxu1 %v1523_v60 }
 0x108   : > { %v689_v8 = vadd.f32 %v688_v6, %v349_v55  ;;  %v882_v9 = vadd.f32 %v881_v7, %v349_v55  ;;  %v690_v10 = vpop.f32.mrb[11].mxu0  ;;  %v883_v11 = vpop.f32.mrb[11].mxu1  ;;  %1462 = vmatpush1.bf16.msra.mxu0 %v1461_v56  ;;  %1526 = vmatpush1.bf16.msra.mxu1 %v1525_v57  ;;  %v1032_v14 = vmax.f32 %v685_v0, 0.0  ;;  %v1034_v15 = vmax.f32 %v878_v1, 0.0 }
 0x109   : > { %v691_v12 = vadd.f32 %v690_v10, %v349_v55  ;;  %v884_v13 = vadd.f32 %v883_v11, %v349_v55  ;;  %v1033_v18 = vmax.f32 %v687_v4, 0.0  ;;  %v1035_v19 = vmax.f32 %v880_v5, 0.0  ;;  %v364_v52 = vpop.permute.xlu0 %363  ;;  %v369_v53 = vpop.permute.xlu1 %368 }
 0x10a   : > { %v1036_v16 = vmax.f32 %v689_v8, 0.0  ;;  %v1038_v17 = vmax.f32 %v882_v9, 0.0 }
 0x10b   : > { %v1037_v20 = vmax.f32 %v691_v12, 0.0  ;;  %v1039_v21 = vmax.f32 %v884_v13, 0.0 }
 0x10c   : > { %v1465_v24 = vpack.c.bf16 %v1036_v16, %v1032_v14  ;;  %v1529_v25 = vpack.c.bf16 %v1038_v17, %v1034_v15 }
 0x10d   : > { %v1463_v26 = vpack.c.bf16 %v1037_v20, %v1033_v18  ;;  %v1527_v27 = vpack.c.bf16 %v1039_v21, %v1035_v19  ;;  %v694_v28 = vpop.f32.mrb[12].mxu0  ;;  %v887_v29 = vpop.f32.mrb[12].mxu1 }
 0x10e   : > { %v695_v30 = vadd.f32 %v694_v28, %v354_v22  ;;  %v888_v31 = vadd.f32 %v887_v29, %v354_v22  ;;  %v696_v32 = vpop.f32.mrb[13].mxu0  ;;  %v889_v33 = vpop.f32.mrb[13].mxu1 }
 0x10f   : > { %v697_v34 = vadd.f32 %v696_v32, %v354_v22  ;;  %v890_v35 = vadd.f32 %v889_v33, %v354_v22  ;;  %v698_v36 = vpop.f32.mrb[14].mxu0  ;;  %v891_v37 = vpop.f32.mrb[14].mxu1  ;;  %1464 = vmatprep.subr.bf16.mxu0 %v1463_v26  ;;  %1528 = vmatprep.subr.bf16.mxu1 %v1527_v27 }
 0x110   : > { %v699_v38 = vadd.f32 %v698_v36, %v359_v23  ;;  %v892_v39 = vadd.f32 %v891_v37, %v359_v23  ;;  %v700_v40 = vpop.f32.mrb[15].mxu0  ;;  %v893_v41 = vpop.f32.mrb[15].mxu1  ;;  %1466 = vmatpush1.bf16.msra.mxu0 %v1465_v24  ;;  %1530 = vmatpush1.bf16.msra.mxu1 %v1529_v25  ;;  %v1040_v44 = vmax.f32 %v695_v30, 0.0  ;;  %v1042_v45 = vmax.f32 %v888_v31, 0.0 }
 0x111   : > { %v701_v42 = vadd.f32 %v700_v40, %v359_v23  ;;  %v894_v43 = vadd.f32 %v893_v41, %v359_v23  ;;  %v1041_v48 = vmax.f32 %v697_v34, 0.0  ;;  %v1043_v49 = vmax.f32 %v890_v35, 0.0  ;;  %v374_v20 = vpop.permute.xlu0 %373  ;;  %v379_v21 = vpop.permute.xlu1 %378 }
 0x112   : > { %v1044_v46 = vmax.f32 %v699_v38, 0.0  ;;  %v1046_v47 = vmax.f32 %v892_v39, 0.0 }
 0x113   : > { %v1045_v50 = vmax.f32 %v701_v42, 0.0  ;;  %v1047_v51 = vmax.f32 %v894_v43, 0.0 }
 0x114   : > { %v1469_v54 = vpack.c.bf16 %v1044_v46, %v1040_v44  ;;  %v1533_v55 = vpack.c.bf16 %v1046_v47, %v1042_v45 }
 0x115   : > { %v1467_v56 = vpack.c.bf16 %v1045_v50, %v1041_v48  ;;  %v1531_v57 = vpack.c.bf16 %v1047_v51, %v1043_v49  ;;  %v704_v59 = vpop.f32.mrb[16].mxu0  ;;  %v897_v60 = vpop.f32.mrb[16].mxu1 }
 0x116   : > { %v705_v62 = vadd.f32 %v704_v59, %v364_v52  ;;  %v898_v63 = vadd.f32 %v897_v60, %v364_v52  ;;  %v706_v0 = vpop.f32.mrb[17].mxu0  ;;  %v899_v1 = vpop.f32.mrb[17].mxu1 }
 0x117   : > { %v707_v2 = vadd.f32 %v706_v0, %v364_v52  ;;  %v900_v3 = vadd.f32 %v899_v1, %v364_v52  ;;  %v708_v4 = vpop.f32.mrb[18].mxu0  ;;  %v901_v5 = vpop.f32.mrb[18].mxu1  ;;  %1468 = vmatprep.subr.bf16.mxu0 %v1467_v56  ;;  %1532 = vmatprep.subr.bf16.mxu1 %v1531_v57 }
 0x118   : > { %v709_v6 = vadd.f32 %v708_v4, %v369_v53  ;;  %v902_v7 = vadd.f32 %v901_v5, %v369_v53  ;;  %v710_v8 = vpop.f32.mrb[19].mxu0  ;;  %v903_v9 = vpop.f32.mrb[19].mxu1  ;;  %1470 = vmatpush1.bf16.msra.mxu0 %v1469_v54  ;;  %1534 = vmatpush1.bf16.msra.mxu1 %v1533_v55  ;;  %v1048_v12 = vmax.f32 %v705_v62, 0.0  ;;  %v1050_v13 = vmax.f32 %v898_v63, 0.0 }
 0x119   : > { %v711_v10 = vadd.f32 %v710_v8, %v369_v53  ;;  %v904_v11 = vadd.f32 %v903_v9, %v369_v53  ;;  %v1049_v16 = vmax.f32 %v707_v2, 0.0  ;;  %v1051_v17 = vmax.f32 %v900_v3, 0.0  ;;  %v384_v50 = vpop.permute.xlu0 %383  ;;  %v389_v51 = vpop.permute.xlu1 %388 }
 0x11a   : > { %v1052_v14 = vmax.f32 %v709_v6, 0.0  ;;  %v1054_v15 = vmax.f32 %v902_v7, 0.0 }
 0x11b   : > { %v1053_v18 = vmax.f32 %v711_v10, 0.0  ;;  %v1055_v19 = vmax.f32 %v904_v11, 0.0 }
 0x11c   : > { %v1473_v22 = vpack.c.bf16 %v1052_v14, %v1048_v12  ;;  %v1537_v23 = vpack.c.bf16 %v1054_v15, %v1050_v13 }
 0x11d   : > { %v1471_v24 = vpack.c.bf16 %v1053_v18, %v1049_v16  ;;  %v1535_v25 = vpack.c.bf16 %v1055_v19, %v1051_v17  ;;  %v714_v26 = vpop.f32.mrb[20].mxu0  ;;  %v907_v27 = vpop.f32.mrb[20].mxu1 }
 0x11e   : > { %v715_v28 = vadd.f32 %v714_v26, %v374_v20  ;;  %v908_v29 = vadd.f32 %v907_v27, %v374_v20  ;;  %v716_v30 = vpop.f32.mrb[21].mxu0  ;;  %v909_v31 = vpop.f32.mrb[21].mxu1 }
 0x11f   : > { %v717_v32 = vadd.f32 %v716_v30, %v374_v20  ;;  %v910_v33 = vadd.f32 %v909_v31, %v374_v20  ;;  %v718_v34 = vpop.f32.mrb[22].mxu0  ;;  %v911_v35 = vpop.f32.mrb[22].mxu1  ;;  %1472 = vmatprep.subr.bf16.mxu0 %v1471_v24  ;;  %1536 = vmatprep.subr.bf16.mxu1 %v1535_v25 }
 0x120   : > { %v719_v36 = vadd.f32 %v718_v34, %v379_v21  ;;  %v912_v37 = vadd.f32 %v911_v35, %v379_v21  ;;  %v720_v38 = vpop.f32.mrb[23].mxu0  ;;  %v913_v39 = vpop.f32.mrb[23].mxu1  ;;  %1474 = vmatpush1.bf16.msra.mxu0 %v1473_v22  ;;  %1538 = vmatpush1.bf16.msra.mxu1 %v1537_v23  ;;  %v1056_v42 = vmax.f32 %v715_v28, 0.0  ;;  %v1058_v43 = vmax.f32 %v908_v29, 0.0 }
 0x121   : > { %v721_v40 = vadd.f32 %v720_v38, %v379_v21  ;;  %v914_v41 = vadd.f32 %v913_v39, %v379_v21  ;;  %v1057_v46 = vmax.f32 %v717_v32, 0.0  ;;  %v1059_v47 = vmax.f32 %v910_v33, 0.0  ;;  %v394_v18 = vpop.permute.xlu0 %393  ;;  %v399_v19 = vpop.permute.xlu1 %398 }
 0x122   : > { %v1060_v44 = vmax.f32 %v719_v36, 0.0  ;;  %v1062_v45 = vmax.f32 %v912_v37, 0.0 }
 0x123   : > { %v1061_v48 = vmax.f32 %v721_v40, 0.0  ;;  %v1063_v49 = vmax.f32 %v914_v41, 0.0 }
 0x124   : > { %v1477_v52 = vpack.c.bf16 %v1060_v44, %v1056_v42  ;;  %v1541_v53 = vpack.c.bf16 %v1062_v45, %v1058_v43 }
 0x125   : > { %v1475_v54 = vpack.c.bf16 %v1061_v48, %v1057_v46  ;;  %v1539_v55 = vpack.c.bf16 %v1063_v49, %v1059_v47  ;;  %v724_v56 = vpop.f32.mrb[24].mxu0  ;;  %v917_v57 = vpop.f32.mrb[24].mxu1 }
 0x126   : > { %v725_v59 = vadd.f32 %v724_v56, %v384_v50  ;;  %v918_v60 = vadd.f32 %v917_v57, %v384_v50  ;;  %v726_v62 = vpop.f32.mrb[25].mxu0  ;;  %v919_v63 = vpop.f32.mrb[25].mxu1 }
 0x127   : > { %v727_v0 = vadd.f32 %v726_v62, %v384_v50  ;;  %v920_v1 = vadd.f32 %v919_v63, %v384_v50  ;;  %v728_v2 = vpop.f32.mrb[26].mxu0  ;;  %v921_v3 = vpop.f32.mrb[26].mxu1  ;;  %1476 = vmatprep.subr.bf16.mxu0 %v1475_v54  ;;  %1540 = vmatprep.subr.bf16.mxu1 %v1539_v55 }
 0x128   : > { %v729_v4 = vadd.f32 %v728_v2, %v389_v51  ;;  %v922_v5 = vadd.f32 %v921_v3, %v389_v51  ;;  %v730_v6 = vpop.f32.mrb[27].mxu0  ;;  %v923_v7 = vpop.f32.mrb[27].mxu1  ;;  %1478 = vmatpush1.bf16.msra.mxu0 %v1477_v52  ;;  %1542 = vmatpush1.bf16.msra.mxu1 %v1541_v53  ;;  %v1064_v10 = vmax.f32 %v725_v59, 0.0  ;;  %v1066_v11 = vmax.f32 %v918_v60, 0.0 }
 0x129   : > { %v731_v8 = vadd.f32 %v730_v6, %v389_v51  ;;  %v924_v9 = vadd.f32 %v923_v7, %v389_v51  ;;  %v1065_v14 = vmax.f32 %v727_v0, 0.0  ;;  %v1067_v15 = vmax.f32 %v920_v1, 0.0  ;;  %v404_v48 = vpop.permute.xlu0 %403  ;;  %v409_v49 = vpop.permute.xlu1 %408 }
 0x12a   : > { %v1068_v12 = vmax.f32 %v729_v4, 0.0  ;;  %v1070_v13 = vmax.f32 %v922_v5, 0.0 }
 0x12b   : > { %v1069_v16 = vmax.f32 %v731_v8, 0.0  ;;  %v1071_v17 = vmax.f32 %v924_v9, 0.0 }
 0x12c   : > { %v1481_v20 = vpack.c.bf16 %v1068_v12, %v1064_v10  ;;  %v1545_v21 = vpack.c.bf16 %v1070_v13, %v1066_v11 }
 0x12d   : > { %v1479_v22 = vpack.c.bf16 %v1069_v16, %v1065_v14  ;;  %v1543_v23 = vpack.c.bf16 %v1071_v17, %v1067_v15  ;;  %v734_v24 = vpop.f32.mrb[28].mxu0  ;;  %v927_v25 = vpop.f32.mrb[28].mxu1 }
 0x12e   : > { %v735_v26 = vadd.f32 %v734_v24, %v394_v18  ;;  %v928_v27 = vadd.f32 %v927_v25, %v394_v18  ;;  %v736_v28 = vpop.f32.mrb[29].mxu0  ;;  %v929_v29 = vpop.f32.mrb[29].mxu1 }
 0x12f   : > { %v737_v30 = vadd.f32 %v736_v28, %v394_v18  ;;  %v930_v31 = vadd.f32 %v929_v29, %v394_v18  ;;  %v738_v32 = vpop.f32.mrb[30].mxu0  ;;  %v931_v33 = vpop.f32.mrb[30].mxu1  ;;  %1480 = vmatprep.subr.bf16.mxu0 %v1479_v22  ;;  %1544 = vmatprep.subr.bf16.mxu1 %v1543_v23 }
 0x130   : > { %v739_v34 = vadd.f32 %v738_v32, %v399_v19  ;;  %v932_v35 = vadd.f32 %v931_v33, %v399_v19  ;;  %v740_v36 = vpop.f32.mrb[31].mxu0  ;;  %v933_v37 = vpop.f32.mrb[31].mxu1  ;;  %1482 = vmatpush1.bf16.msra.mxu0 %v1481_v20  ;;  %1546 = vmatpush1.bf16.msra.mxu1 %v1545_v21  ;;  %v1072_v40 = vmax.f32 %v735_v26, 0.0  ;;  %v1074_v41 = vmax.f32 %v928_v27, 0.0 }
 0x131   : > { %v741_v38 = vadd.f32 %v740_v36, %v399_v19  ;;  %v934_v39 = vadd.f32 %v933_v37, %v399_v19  ;;  %v1073_v44 = vmax.f32 %v737_v30, 0.0  ;;  %v1075_v45 = vmax.f32 %v930_v31, 0.0  ;;  %v414_v16 = vpop.permute.xlu0 %413  ;;  %v419_v17 = vpop.permute.xlu1 %418 }
 0x132   : > { %v1076_v42 = vmax.f32 %v739_v34, 0.0  ;;  %v1078_v43 = vmax.f32 %v932_v35, 0.0 }
 0x133   : > { %v1077_v46 = vmax.f32 %v741_v38, 0.0  ;;  %v1079_v47 = vmax.f32 %v934_v39, 0.0 }
 0x134   : > { %v1485_v50 = vpack.c.bf16 %v1076_v42, %v1072_v40  ;;  %v1549_v51 = vpack.c.bf16 %v1078_v43, %v1074_v41 }
 0x135   : > { %v1483_v52 = vpack.c.bf16 %v1077_v46, %v1073_v44  ;;  %v1547_v53 = vpack.c.bf16 %v1079_v47, %v1075_v45  ;;  %v744_v54 = vpop.f32.mrb[32].mxu0  ;;  %v937_v55 = vpop.f32.mrb[32].mxu1 }
 0x136   : > { %v745_v56 = vadd.f32 %v744_v54, %v404_v48  ;;  %v938_v57 = vadd.f32 %v937_v55, %v404_v48  ;;  %v746_v59 = vpop.f32.mrb[33].mxu0  ;;  %v939_v60 = vpop.f32.mrb[33].mxu1 }
 0x137   : > { %v747_v62 = vadd.f32 %v746_v59, %v404_v48  ;;  %v940_v63 = vadd.f32 %v939_v60, %v404_v48  ;;  %v748_v0 = vpop.f32.mrb[34].mxu0  ;;  %v941_v1 = vpop.f32.mrb[34].mxu1  ;;  %1484 = vmatprep.subr.bf16.mxu0 %v1483_v52  ;;  %1548 = vmatprep.subr.bf16.mxu1 %v1547_v53 }
 0x138   : > { %v749_v2 = vadd.f32 %v748_v0, %v409_v49  ;;  %v942_v3 = vadd.f32 %v941_v1, %v409_v49  ;;  %v750_v4 = vpop.f32.mrb[35].mxu0  ;;  %v943_v5 = vpop.f32.mrb[35].mxu1  ;;  %1486 = vmatpush1.bf16.msra.mxu0 %v1485_v50  ;;  %1550 = vmatpush1.bf16.msra.mxu1 %v1549_v51  ;;  %v1080_v8 = vmax.f32 %v745_v56, 0.0  ;;  %v1082_v9 = vmax.f32 %v938_v57, 0.0 }
 0x139   : > { %v751_v6 = vadd.f32 %v750_v4, %v409_v49  ;;  %v944_v7 = vadd.f32 %v943_v5, %v409_v49  ;;  %v1081_v12 = vmax.f32 %v747_v62, 0.0  ;;  %v1083_v13 = vmax.f32 %v940_v63, 0.0  ;;  %v424_v46 = vpop.permute.xlu0 %423  ;;  %v429_v47 = vpop.permute.xlu1 %428 }
 0x13a   : > { %v1084_v10 = vmax.f32 %v749_v2, 0.0  ;;  %v1086_v11 = vmax.f32 %v942_v3, 0.0 }
 0x13b   : > { %v1085_v14 = vmax.f32 %v751_v6, 0.0  ;;  %v1087_v15 = vmax.f32 %v944_v7, 0.0 }
 0x13c   : > { %v1489_v18 = vpack.c.bf16 %v1084_v10, %v1080_v8  ;;  %v1553_v19 = vpack.c.bf16 %v1086_v11, %v1082_v9 }
 0x13d   : > { %v1487_v20 = vpack.c.bf16 %v1085_v14, %v1081_v12  ;;  %v1551_v21 = vpack.c.bf16 %v1087_v15, %v1083_v13  ;;  %v754_v22 = vpop.f32.mrb[36].mxu0  ;;  %v947_v23 = vpop.f32.mrb[36].mxu1 }
 0x13e   : > { %v755_v24 = vadd.f32 %v754_v22, %v414_v16  ;;  %v948_v25 = vadd.f32 %v947_v23, %v414_v16  ;;  %v756_v26 = vpop.f32.mrb[37].mxu0  ;;  %v949_v27 = vpop.f32.mrb[37].mxu1 }
 0x13f   : > { %v757_v28 = vadd.f32 %v756_v26, %v414_v16  ;;  %v950_v29 = vadd.f32 %v949_v27, %v414_v16  ;;  %v758_v30 = vpop.f32.mrb[38].mxu0  ;;  %v951_v31 = vpop.f32.mrb[38].mxu1  ;;  %1488 = vmatprep.subr.bf16.mxu0 %v1487_v20  ;;  %1552 = vmatprep.subr.bf16.mxu1 %v1551_v21 }
 0x140   : > { %v759_v32 = vadd.f32 %v758_v30, %v419_v17  ;;  %v952_v33 = vadd.f32 %v951_v31, %v419_v17  ;;  %v760_v34 = vpop.f32.mrb[39].mxu0  ;;  %v953_v35 = vpop.f32.mrb[39].mxu1  ;;  %1490 = vmatpush1.bf16.msra.mxu0 %v1489_v18  ;;  %1554 = vmatpush1.bf16.msra.mxu1 %v1553_v19  ;;  %v1088_v38 = vmax.f32 %v755_v24, 0.0  ;;  %v1090_v39 = vmax.f32 %v948_v25, 0.0 }
 0x141   : > { %v761_v36 = vadd.f32 %v760_v34, %v419_v17  ;;  %v954_v37 = vadd.f32 %v953_v35, %v419_v17  ;;  %v1089_v42 = vmax.f32 %v757_v28, 0.0  ;;  %v1091_v43 = vmax.f32 %v950_v29, 0.0  ;;  %v434_v14 = vpop.permute.xlu0 %433  ;;  %v439_v15 = vpop.permute.xlu1 %438 }
 0x142   : > { %v1092_v40 = vmax.f32 %v759_v32, 0.0  ;;  %v1094_v41 = vmax.f32 %v952_v33, 0.0 }
 0x143   : > { %v1093_v44 = vmax.f32 %v761_v36, 0.0  ;;  %v1095_v45 = vmax.f32 %v954_v37, 0.0 }
 0x144   : > { %v1493_v48 = vpack.c.bf16 %v1092_v40, %v1088_v38  ;;  %v1557_v49 = vpack.c.bf16 %v1094_v41, %v1090_v39 }
 0x145   : > { %v1491_v50 = vpack.c.bf16 %v1093_v44, %v1089_v42  ;;  %v1555_v51 = vpack.c.bf16 %v1095_v45, %v1091_v43  ;;  %v764_v52 = vpop.f32.mrb[40].mxu0  ;;  %v957_v53 = vpop.f32.mrb[40].mxu1 }
 0x146   : > { %v765_v54 = vadd.f32 %v764_v52, %v424_v46  ;;  %v958_v55 = vadd.f32 %v957_v53, %v424_v46  ;;  %v766_v56 = vpop.f32.mrb[41].mxu0  ;;  %v959_v57 = vpop.f32.mrb[41].mxu1 }
 0x147   : > { %v767_v59 = vadd.f32 %v766_v56, %v424_v46  ;;  %v960_v60 = vadd.f32 %v959_v57, %v424_v46  ;;  %v768_v62 = vpop.f32.mrb[42].mxu0  ;;  %v961_v63 = vpop.f32.mrb[42].mxu1  ;;  %1492 = vmatprep.subr.bf16.mxu0 %v1491_v50  ;;  %1556 = vmatprep.subr.bf16.mxu1 %v1555_v51 }
 0x148   : > { %v769_v0 = vadd.f32 %v768_v62, %v429_v47  ;;  %v962_v1 = vadd.f32 %v961_v63, %v429_v47  ;;  %v770_v2 = vpop.f32.mrb[43].mxu0  ;;  %v963_v3 = vpop.f32.mrb[43].mxu1  ;;  %1494 = vmatpush1.bf16.msra.mxu0 %v1493_v48  ;;  %1558 = vmatpush1.bf16.msra.mxu1 %v1557_v49  ;;  %v1096_v6 = vmax.f32 %v765_v54, 0.0  ;;  %v1098_v7 = vmax.f32 %v958_v55, 0.0 }
 0x149   : > { %v771_v4 = vadd.f32 %v770_v2, %v429_v47  ;;  %v964_v5 = vadd.f32 %v963_v3, %v429_v47  ;;  %v1097_v10 = vmax.f32 %v767_v59, 0.0  ;;  %v1099_v11 = vmax.f32 %v960_v60, 0.0  ;;  %v444_v44 = vpop.permute.xlu0 %443  ;;  %v449_v45 = vpop.permute.xlu1 %448 }
 0x14a   : > { %v1100_v8 = vmax.f32 %v769_v0, 0.0  ;;  %v1102_v9 = vmax.f32 %v962_v1, 0.0 }
 0x14b   : > { %v1101_v12 = vmax.f32 %v771_v4, 0.0  ;;  %v1103_v13 = vmax.f32 %v964_v5, 0.0 }
 0x14c   : > { %v1497_v16 = vpack.c.bf16 %v1100_v8, %v1096_v6  ;;  %v1561_v17 = vpack.c.bf16 %v1102_v9, %v1098_v7 }
 0x14d   : > { %v1495_v18 = vpack.c.bf16 %v1101_v12, %v1097_v10  ;;  %v1559_v19 = vpack.c.bf16 %v1103_v13, %v1099_v11  ;;  %v774_v20 = vpop.f32.mrb[44].mxu0  ;;  %v967_v21 = vpop.f32.mrb[44].mxu1 }
 0x14e   : > { %v775_v22 = vadd.f32 %v774_v20, %v434_v14  ;;  %v968_v23 = vadd.f32 %v967_v21, %v434_v14  ;;  %v776_v24 = vpop.f32.mrb[45].mxu0  ;;  %v969_v25 = vpop.f32.mrb[45].mxu1 }
 0x14f   : > { %v777_v26 = vadd.f32 %v776_v24, %v434_v14  ;;  %v970_v27 = vadd.f32 %v969_v25, %v434_v14  ;;  %v778_v28 = vpop.f32.mrb[46].mxu0  ;;  %v971_v29 = vpop.f32.mrb[46].mxu1  ;;  %1496 = vmatprep.subr.bf16.mxu0 %v1495_v18  ;;  %1560 = vmatprep.subr.bf16.mxu1 %v1559_v19 }
 0x150   : > { %v779_v30 = vadd.f32 %v778_v28, %v439_v15  ;;  %v972_v31 = vadd.f32 %v971_v29, %v439_v15  ;;  %v780_v32 = vpop.f32.mrb[47].mxu0  ;;  %v973_v33 = vpop.f32.mrb[47].mxu1  ;;  %1498 = vmatpush1.bf16.msra.mxu0 %v1497_v16  ;;  %1562 = vmatpush1.bf16.msra.mxu1 %v1561_v17  ;;  %v1104_v36 = vmax.f32 %v775_v22, 0.0  ;;  %v1106_v37 = vmax.f32 %v968_v23, 0.0 }
 0x151   : > { %v781_v34 = vadd.f32 %v780_v32, %v439_v15  ;;  %v974_v35 = vadd.f32 %v973_v33, %v439_v15  ;;  %v1105_v40 = vmax.f32 %v777_v26, 0.0  ;;  %v1107_v41 = vmax.f32 %v970_v27, 0.0  ;;  %v454_v12 = vpop.permute.xlu0 %453  ;;  %v459_v13 = vpop.permute.xlu1 %458 }
 0x152   : > { %v1108_v38 = vmax.f32 %v779_v30, 0.0  ;;  %v1110_v39 = vmax.f32 %v972_v31, 0.0 }
 0x153   : > { %v1109_v42 = vmax.f32 %v781_v34, 0.0  ;;  %v1111_v43 = vmax.f32 %v974_v35, 0.0 }
 0x154   : > { %v1501_v46 = vpack.c.bf16 %v1108_v38, %v1104_v36  ;;  %v1565_v47 = vpack.c.bf16 %v1110_v39, %v1106_v37 }
 0x155   : > { %v1499_v48 = vpack.c.bf16 %v1109_v42, %v1105_v40  ;;  %v1563_v49 = vpack.c.bf16 %v1111_v43, %v1107_v41  ;;  %v784_v50 = vpop.f32.mrb[48].mxu0  ;;  %v977_v51 = vpop.f32.mrb[48].mxu1 }
 0x156   : > { %v785_v52 = vadd.f32 %v784_v50, %v444_v44  ;;  %v978_v53 = vadd.f32 %v977_v51, %v444_v44  ;;  %v786_v54 = vpop.f32.mrb[49].mxu0  ;;  %v979_v55 = vpop.f32.mrb[49].mxu1 }
 0x157   : > { %v787_v56 = vadd.f32 %v786_v54, %v444_v44  ;;  %v980_v57 = vadd.f32 %v979_v55, %v444_v44  ;;  %v788_v59 = vpop.f32.mrb[50].mxu0  ;;  %v981_v60 = vpop.f32.mrb[50].mxu1  ;;  %1500 = vmatprep.subr.bf16.mxu0 %v1499_v48  ;;  %1564 = vmatprep.subr.bf16.mxu1 %v1563_v49 }
 0x158   : > { %v789_v62 = vadd.f32 %v788_v59, %v449_v45  ;;  %v982_v63 = vadd.f32 %v981_v60, %v449_v45  ;;  %v790_v0 = vpop.f32.mrb[51].mxu0  ;;  %v983_v1 = vpop.f32.mrb[51].mxu1  ;;  %1502 = vmatpush1.bf16.msra.mxu0 %v1501_v46  ;;  %1566 = vmatpush1.bf16.msra.mxu1 %v1565_v47  ;;  %v1112_v4 = vmax.f32 %v785_v52, 0.0  ;;  %v1114_v5 = vmax.f32 %v978_v53, 0.0 }
 0x159   : > { %v791_v2 = vadd.f32 %v790_v0, %v449_v45  ;;  %v984_v3 = vadd.f32 %v983_v1, %v449_v45  ;;  %v1113_v8 = vmax.f32 %v787_v56, 0.0  ;;  %v1115_v9 = vmax.f32 %v980_v57, 0.0  ;;  %v464_v42 = vpop.permute.xlu0 %463  ;;  %v469_v43 = vpop.permute.xlu1 %468 }
 0x15a   : > { %v1116_v6 = vmax.f32 %v789_v62, 0.0  ;;  %v1118_v7 = vmax.f32 %v982_v63, 0.0 }
 0x15b   : > { %v1117_v10 = vmax.f32 %v791_v2, 0.0  ;;  %v1119_v11 = vmax.f32 %v984_v3, 0.0 }
 0x15c   : > { %v1505_v14 = vpack.c.bf16 %v1116_v6, %v1112_v4  ;;  %v1569_v15 = vpack.c.bf16 %v1118_v7, %v1114_v5 }
 0x15d   : > { %v1503_v16 = vpack.c.bf16 %v1117_v10, %v1113_v8  ;;  %v1567_v17 = vpack.c.bf16 %v1119_v11, %v1115_v9  ;;  %v794_v18 = vpop.f32.mrb[52].mxu0  ;;  %v987_v19 = vpop.f32.mrb[52].mxu1 }
 0x15e   : > { %v795_v20 = vadd.f32 %v794_v18, %v454_v12  ;;  %v988_v21 = vadd.f32 %v987_v19, %v454_v12  ;;  %v796_v22 = vpop.f32.mrb[53].mxu0  ;;  %v989_v23 = vpop.f32.mrb[53].mxu1 }
 0x15f   : > { %v797_v24 = vadd.f32 %v796_v22, %v454_v12  ;;  %v990_v25 = vadd.f32 %v989_v23, %v454_v12  ;;  %v798_v26 = vpop.f32.mrb[54].mxu0  ;;  %v991_v27 = vpop.f32.mrb[54].mxu1  ;;  %1504 = vmatprep.subr.bf16.mxu0 %v1503_v16  ;;  %1568 = vmatprep.subr.bf16.mxu1 %v1567_v17 }
 0x160   : > { %v799_v28 = vadd.f32 %v798_v26, %v459_v13  ;;  %v992_v29 = vadd.f32 %v991_v27, %v459_v13  ;;  %v800_v30 = vpop.f32.mrb[55].mxu0  ;;  %v993_v31 = vpop.f32.mrb[55].mxu1  ;;  %1506 = vmatpush1.bf16.msra.mxu0 %v1505_v14  ;;  %1570 = vmatpush1.bf16.msra.mxu1 %v1569_v15  ;;  %v1120_v34 = vmax.f32 %v795_v20, 0.0  ;;  %v1122_v35 = vmax.f32 %v988_v21, 0.0 }
 0x161   : > { %v801_v32 = vadd.f32 %v800_v30, %v459_v13  ;;  %v994_v33 = vadd.f32 %v993_v31, %v459_v13  ;;  %v1121_v38 = vmax.f32 %v797_v24, 0.0  ;;  %v1123_v39 = vmax.f32 %v990_v25, 0.0  ;;  %v474_v10 = vpop.permute.xlu0 %473  ;;  %v479_v11 = vpop.permute.xlu1 %478 }
 0x162   : > { %v1124_v36 = vmax.f32 %v799_v28, 0.0  ;;  %v1126_v37 = vmax.f32 %v992_v29, 0.0 }
 0x163   : > { %v1125_v40 = vmax.f32 %v801_v32, 0.0  ;;  %v1127_v41 = vmax.f32 %v994_v33, 0.0  ;;  %v1150_v32 = vsub.s32 0, %v1941_v61 }
 0x164   : > { %v1509_v44 = vpack.c.bf16 %v1124_v36, %v1120_v34  ;;  %v1573_v45 = vpack.c.bf16 %v1126_v37, %v1122_v35 }
 0x165   : > { %v1507_v46 = vpack.c.bf16 %v1125_v40, %v1121_v38  ;;  %v1571_v47 = vpack.c.bf16 %v1127_v41, %v1123_v39  ;;  %v804_v48 = vpop.f32.mrb[56].mxu0  ;;  %v997_v49 = vpop.f32.mrb[56].mxu1 }
 0x166   : > { %v805_v50 = vadd.f32 %v804_v48, %v464_v42  ;;  %v998_v51 = vadd.f32 %v997_v49, %v464_v42  ;;  %v806_v52 = vpop.f32.mrb[57].mxu0  ;;  %v999_v53 = vpop.f32.mrb[57].mxu1  ;;  %v1146_v49 = vstv %s1145_s7 }
 0x167   : > { %v807_v54 = vadd.f32 %v806_v52, %v464_v42  ;;  %v1000_v55 = vadd.f32 %v999_v53, %v464_v42  ;;  %v808_v56 = vpop.f32.mrb[58].mxu0  ;;  %v1001_v57 = vpop.f32.mrb[58].mxu1  ;;  %1508 = vmatprep.subr.bf16.mxu0 %v1507_v46  ;;  %1572 = vmatprep.subr.bf16.mxu1 %v1571_v47  ;;  %v1659_v47 = vmov 1966171168  }
 0x168   : > { %v809_v59 = vadd.f32 %v808_v56, %v469_v43  ;;  %v1002_v60 = vadd.f32 %v1001_v57, %v469_v43  ;;  %v810_v62 = vpop.f32.mrb[59].mxu0  ;;  %v1003_v63 = vpop.f32.mrb[59].mxu1  ;;  %1510 = vmatpush1.bf16.msra.mxu0 %v1509_v44  ;;  %1574 = vmatpush1.bf16.msra.mxu1 %v1573_v45  ;;  %v1128_v2 = vmax.f32 %v805_v50, 0.0  ;;  %v1130_v3 = vmax.f32 %v998_v51, 0.0  ;;  %v1633_v45 = vld [vmem:[%s1971_s3] sm:$0x3] }
 0x169   : > { %v811_v0 = vadd.f32 %v810_v62, %v469_v43  ;;  %v1004_v1 = vadd.f32 %v1003_v63, %v469_v43  ;;  %v1129_v6 = vmax.f32 %v807_v54, 0.0  ;;  %v1131_v7 = vmax.f32 %v1000_v55, 0.0 }
 0x16a   : > { %v1132_v4 = vmax.f32 %v809_v59, 0.0  ;;  %v1134_v5 = vmax.f32 %v1002_v60, 0.0  ;;  %v1151_v46 = vrot.slane %v1633_v45, %v1150_v32  ;;  %v1307_v48 = vunpack.c.l.s4 %v1659_v47 }
 0x16b   : > { %v1133_v8 = vmax.f32 %v811_v0, 0.0  ;;  %v1135_v9 = vmax.f32 %v1004_v1, 0.0 }
 0x16c   : > { %v1513_v12 = vpack.c.bf16 %v1132_v4, %v1128_v2  ;;  %v1577_v13 = vpack.c.bf16 %v1134_v5, %v1130_v3  ;;  %v1308_v50 = vunpack.c.0.s8 %v1307_v48 }
 0x16d   : > { %v1511_v14 = vpack.c.bf16 %v1133_v8, %v1129_v6  ;;  %v1575_v15 = vpack.c.bf16 %v1135_v9, %v1131_v7  ;;  %v814_v16 = vpop.f32.mrb[60].mxu0  ;;  %v1007_v17 = vpop.f32.mrb[60].mxu1 }
 0x16e   : > { %v815_v18 = vadd.f32 %v814_v16, %v474_v10  ;;  %v1008_v19 = vadd.f32 %v1007_v17, %v474_v10  ;;  %v816_v20 = vpop.f32.mrb[61].mxu0  ;;  %v1009_v21 = vpop.f32.mrb[61].mxu1  ;;  %v1311_v59 = vsub.s32 %v1308_v50, %v1941_v61 }
 0x16f   : > { %v817_v22 = vadd.f32 %v816_v20, %v474_v10  ;;  %v1010_v23 = vadd.f32 %v1009_v21, %v474_v10  ;;  %v818_v24 = vpop.f32.mrb[62].mxu0  ;;  %v1011_v25 = vpop.f32.mrb[62].mxu1  ;;  %1512 = vmatprep.subr.bf16.mxu0 %v1511_v14  ;;  %1576 = vmatprep.subr.bf16.mxu1 %v1575_v15 }
 0x170   : > { %v819_v26 = vadd.f32 %v818_v24, %v479_v11  ;;  %v1012_v27 = vadd.f32 %v1011_v25, %v479_v11  ;;  %v820_v28 = vpop.f32.mrb[63].mxu0  ;;  %v1013_v29 = vpop.f32.mrb[63].mxu1  ;;  %1514 = vmatpush1.bf16.msra.mxu0 %v1513_v12  ;;  %1578 = vmatpush1.bf16.msra.mxu1 %v1577_v13  ;;  %v1136_v33 = vmax.f32 %v815_v18, 0.0  ;;  %v1138_v34 = vmax.f32 %v1008_v19, 0.0 }
 0x171   : > { %v821_v30 = vadd.f32 %v820_v28, %v479_v11  ;;  %v1014_v31 = vadd.f32 %v1013_v29, %v479_v11  ;;  %v1137_v37 = vmax.f32 %v817_v22, 0.0  ;;  %v1139_v38 = vmax.f32 %v1010_v23, 0.0 }
 0x172   : > { %v1140_v35 = vmax.f32 %v819_v26, 0.0  ;;  %v1142_v36 = vmax.f32 %v1012_v27, 0.0 }
 0x173   : > { %v1141_v39 = vmax.f32 %v821_v30, 0.0  ;;  %v1143_v40 = vmax.f32 %v1014_v31, 0.0 }
 0x174   : > { %v1517_v41 = vpack.c.bf16 %v1140_v35, %v1136_v33  ;;  %v1581_v42 = vpack.c.bf16 %v1142_v36, %v1138_v34 }
 0x175   : > { %v1515_v43 = vpack.c.bf16 %v1141_v39, %v1137_v37  ;;  %v1579_v44 = vpack.c.bf16 %v1143_v40, %v1139_v38 }
 0x177   : > { %1516 = vmatprep.subr.bf16.mxu0 %v1515_v43  ;;  %1580 = vmatprep.subr.bf16.mxu1 %v1579_v44 }
 0x178   : > { %1518 = vmatpush1.bf16.msra.mxu0 %v1517_v41  ;;  %1582 = vmatpush1.bf16.msra.mxu1 %v1581_v42 }
 0x17b   : > { %1223 = vmatmul.mubr.f32.vlgmr.msra.gmra.mrb[64].mxu0 %v1151_v46  ;;  %1294 = vmatmul.mubr.f32.vlgmr.msra.gmra.mrb[64].mxu1 %v1151_v46 }
 0x24e   : > { %v1224_v51 = vpop.f32.mrb[64].mxu0  ;;  %v1295_v52 = vpop.f32.mrb[64].mxu1 }
 0x24f   : > { %v1225_v53 = vadd.f32 %v1224_v51, %v1146_v49  ;;  %v1296_v54 = vadd.f32 %v1295_v52, %v1146_v49  ;;  %v1226_v55 = vpop.f32.mrb[65].mxu0  ;;  %v1297_v56 = vpop.f32.mrb[65].mxu1 }
 0x250   : > { %v1227_v57 = vadd.f32 %v1226_v55, %v1146_v49  ;;  %v1298_v60 = vadd.f32 %v1297_v56, %v1146_v49 }
 0x252   : > { %v1304_v62 = vcombine.low %v1225_v53, %v1227_v57  ;;  %v1305_v63 = vcombine.low %v1296_v54, %v1298_v60 }
 0x254   : > { %v1312_v0 = vrot.slane %v1304_v62, %v1311_v59  ;;  %v1319_v1 = vrot.slane %v1305_v63, %v1311_v59 }
 0x256   : > { %v1320_v2 = vcombine.low %v1312_v0, %v1319_v1 }
 0x258   : > { %v1327_v3 = vrot.slane %v1320_v2, %v1311_v59 }
 0x25a   : > { %1333 = vst.msk [vmem:[%s250_s9] sm:$0xf] %vm1331_vm1, %v1327_v3 }
 0x25b PF: > { %p13_p9 = scmp.ge.s32.totalorder %s1710_s23, 4   ;;  %s1974_s20 = smov %s1652_s21 }
 0x25c   : > { %s1975_s21 = smov %s1719_s26  ;;  %s1976_s22 = smov %s1710_s23 }
 0x25d   :  { %15 = sbr.rel (!%p13_p9) target bundleno = 4 (0x4), region = 98 }

</bundles_post_ra>
